<compile_context>
chip_gen: v7x
topology: tpu7x:2x2x1
jax: 0.10.0
libtpu: 0.0.40
codegen_flags: <defaults>
</compile_context>

<pallas_src>
import jax
import jax.numpy as jnp
from jax.experimental import pallas as pl
from jax.experimental.pallas import tpu as pltpu


# ----------------------------------------------------------------------------
# Kernel
# ----------------------------------------------------------------------------
def _automask_kernel(img_ref, thr_ref, w_ref, b_ref, out_ref):
    # img_ref : (1, V*C, HWt)  all views/channels of one batch element (dense)
    # thr_ref : (1, 1,   HWt)  threshold chunk for this batch element
    # w_ref   : (C,)  SMEM     fused 1x1-conv weight  (0.5 * w)
    # b_ref   : (1,)  SMEM     fused 1x1-conv bias    (b + 0.5 * sum(w))
    # out_ref : (1, 2*V, HWt)  interleaved rows [proc_v0, thr, proc_v1, thr, ...]
    two_v = out_ref.shape[1]
    v = two_v // 2
    c = img_ref.shape[1] // v

    x = img_ref[0].astype(jnp.float32)          # single dense (V*C, HWt) load
    thr = thr_ref[0].astype(out_ref.dtype)      # (1, HWt), cast exactly once

    w = [w_ref[ci] for ci in range(c)]          # SMEM scalar reads, hoisted
    b = b_ref[0]

    rows = []
    for vi in range(v):                         # V, C tiny -> fully unrolled VPU
        base = vi * c
        acc = x[base:base + 1, :] * w[0]
        for ci in range(1, c):
            acc = acc + x[base + ci:base + ci + 1, :] * w[ci]
        rows.append((acc + b).astype(out_ref.dtype))
        rows.append(thr)                        # threshold shared by all views

    # One lane- and sublane-dense store of the whole interleaved block.
    out_ref[0] = jnp.concatenate(rows, axis=0)


# ----------------------------------------------------------------------------
# Tiling helpers (padding-aware, per-generation VMEM sizing)
# ----------------------------------------------------------------------------
def _round_up(x, m):
    return (x + m - 1) // m * m


def _sublanes(dtype):
    # f32 -> 8 sublanes / tile, bf16 -> 16, int8 -> 32
    return max(8, 32 // jnp.dtype(dtype).itemsize)


def _vmem_capacity_bytes():
    try:
        cap = int(getattr(pltpu.get_tpu_info(), "vmem_capacity_bytes"))
        if cap > 0:
            return cap
    except Exception:
        pass
    return 64 * 1024 * 1024            # conservative fallback (v7x per-TC size)


def _per_lane_bytes(v, c, img_dtype, thr_dtype, out_dtype):
    """Double-buffered VMEM bytes per 1-lane column of an HW tile, including
    sublane padding of each block's second-minor dim to the dtype tile size."""
    def tile_bytes(rows, dtype):
        dt = jnp.dtype(dtype)
        return _round_up(rows, _sublanes(dt)) * dt.itemsize
    per = (tile_bytes(v * c, img_dtype)      # image block  (V*C padded)
           + tile_bytes(1, thr_dtype)        # threshold    (1 -> 8/16)
           + tile_bytes(2 * v, out_dtype))   # output block (2V padded)
    return 2 * per                            # double-buffered


def _pick_hw_tile(hw, per_lane_bytes, budget_bytes, n, min_steps=8):
    """Largest 128-multiple HW chunk that fits the VMEM budget while keeping
    at least ~min_steps grid steps (feeds both v7x TCs, hides DMA prologue)."""
    if hw <= 128:
        return hw                                  # full-extent last dim
    tile = (budget_bytes // per_lane_bytes) // 128 * 128
    target_chunks = max(1, -(-min_steps // max(n, 1)))
    step_cap = _round_up(-(-hw // target_chunks), 128)
    tile = min(tile, step_cap, _round_up(hw, 128))
    return max(tile, 128)


# ----------------------------------------------------------------------------
# Wrapper
# ----------------------------------------------------------------------------
def automask_forward(images, threshold, conv_w, conv_b):
    """images: (N, V, C, H, W); threshold: (N, H, W); conv_w: (C,); conv_b: ()."""
    n, v, c, h, w = images.shape
    hw = h * w
    out_dtype = jnp.result_type(images.dtype, threshold.dtype, conv_w.dtype)

    # Free views only -- no wrapper-side casts or extra HBM passes.
    img_flat = images.reshape(n, v * c, hw)
    thr_flat = threshold.reshape(n, 1, hw)

    # Fold the x*0.5+0.5 normalization into the 1x1-conv parameters.
    w_flat = conv_w.reshape(c).astype(jnp.float32)
    w_eff = 0.5 * w_flat                                                # (C,)
    b_eff = (jnp.reshape(conv_b, ()).astype(jnp.float32)
             + 0.5 * jnp.sum(w_flat)).reshape(1)                        # (1,)

    # Per-generation VMEM sizing: ~cap/4 tile budget, ~3*cap/4 scoped limit
    # (v5e/v6e: 32 MiB tiles / 96 MiB limit; v7x: 16 MiB / 48 MiB).
    vmem_cap = _vmem_capacity_bytes()
    budget = vmem_cap // 4
    vmem_limit = min((vmem_cap * 3) // 4, 112 * 1024 * 1024)

    per_lane = _per_lane_bytes(v, c, images.dtype, threshold.dtype, out_dtype)
    hwt = _pick_hw_tile(hw, per_lane, budget, n)
    chunks = pl.cdiv(hw, hwt)                       # ragged last block OK

    out = pl.pallas_call(
        _automask_kernel,
        out_shape=jax.ShapeDtypeStruct((n, 2 * v, hw), out_dtype),
        grid_spec=pltpu.PrefetchScalarGridSpec(
            num_scalar_prefetch=0,
            grid=(n, chunks),
            in_specs=[
                # all V*C rows of one batch element, one HW chunk (dense block)
                pl.BlockSpec((1, v * c, hwt), lambda i, t: (i, 0, t)),
                # threshold chunk: read once per step, reused by all V views
                pl.BlockSpec((1, 1, hwt), lambda i, t: (i, 0, t)),
                # fused conv params as SMEM scalars
                pl.BlockSpec(memory_space=pltpu.MemorySpace.SMEM),
                pl.BlockSpec(memory_space=pltpu.MemorySpace.SMEM),
            ],
            out_specs=pl.BlockSpec((1, 2 * v, hwt), lambda i, t: (i, 0, t)),
        ),
        compiler_params=pltpu.CompilerParams(
            dimension_semantics=("parallel", "parallel"),
            vmem_limit_bytes=vmem_limit,
        ),
    )(img_flat, thr_flat, w_eff, b_eff)

    # torch: stack((proc (n,v,1,h,w), thr (n,v,1,h,w)), dim=2) -> (n,v,2,1,h,w).
    # (n, 2v, hw) row-major == (n, v, 2, h, w): this reshape is a free view.
    return out.reshape(n, v, 2, 1, h, w)


# ----------------------------------------------------------------------------
# Pure-JAX reference
# ----------------------------------------------------------------------------
def automask_reference(images, threshold, conv_w, conv_b):
    n, v, c, h, w = images.shape
    proc = jnp.einsum("nvchw,c->nvhw", images * 0.5 + 0.5, conv_w) + conv_b
    proc = proc[:, :, None]                                        # (n,v,1,h,w)
    thr = jnp.broadcast_to(threshold.reshape(n, 1, 1, h, w), (n, v, 1, h, w))
    return jnp.stack([proc, thr], axis=2)                          # (n,v,2,1,h,w)


if __name__ == "__main__":
    n, v, c, h, w = 2, 3, 4, 16, 16

    key = jax.random.PRNGKey(0)
    k_img, k_thr = jax.random.split(key)
    images = jax.random.normal(k_img, (n, v, c, h, w), dtype=jnp.float32)
    threshold = jax.random.uniform(k_thr, (n, h, w), dtype=jnp.float32)

    # Deterministic synthetic 1x1-conv params of the image_processor (C -> 1).
    # TODO(synk): the real image_processor is an arbitrary nn.Module; modeled
    # here as normalize + 1x1 conv (stack(dim=2) requires a 1-channel output).
    conv_w = (jnp.arange(c, dtype=jnp.float32) - (c - 1) / 2.0) * 0.25 + 0.1
    conv_b = jnp.array(0.05, dtype=jnp.float32)

    out = automask_forward(images, threshold, conv_w, conv_b)
    out = jax.block_until_ready(out)

    ref = automask_reference(images, threshold, conv_w, conv_b)
    assert out.shape == (n, v, 2, 1, h, w), out.shape
    assert jnp.allclose(out, ref, atol=1e-5, rtol=1e-5), "mismatch vs reference"

    print("KERNEL_OK")
</pallas_src>

<mosaic_0001>
module attributes {stable_mosaic.version = 11 : i64} {
  func.func @_automask_kernel(%arg0: i32, %arg1: i32, %arg2: memref<1x12x128xf32, #tpu.memory_space<vmem>>, %arg3: memref<1x1x128xf32, #tpu.memory_space<vmem>>, %arg4: memref<4xf32, #tpu.memory_space<smem>>, %arg5: memref<1xf32, #tpu.memory_space<smem>>, %arg6: memref<1x6x128xf32, #tpu.memory_space<vmem>>) attributes {dimension_semantics = [#tpu.dimension_semantics<parallel>, #tpu.dimension_semantics<parallel>], iteration_bounds = array<i64: 2, 2>, scalar_prefetch = 0 : i64, scratch_operands = 0 : i64, tpu.core_type = #tpu.core_type<tc>, window_params = [{transform_indices = @transform_0, window_bounds = array<i64: 1, 12, 128>}, {transform_indices = @transform_1, window_bounds = array<i64: 1, 1, 128>}, {transform_indices = @transform_2, window_bounds = array<i64: 4>}, {transform_indices = @transform_3, window_bounds = array<i64: 1>}, {transform_indices = @transform_4, window_bounds = array<i64: 1, 6, 128>}]} {
    %c0 = arith.constant 0 : index
    %c0_0 = arith.constant 0 : index
    %c0_1 = arith.constant 0 : index
    %0 = vector.load %arg2[%c0, %c0_0, %c0_1] : memref<1x12x128xf32, #tpu.memory_space<vmem>>, vector<1x12x128xf32>
    %1 = vector.shape_cast %0 : vector<1x12x128xf32> to vector<12x128xf32>
    %c0_2 = arith.constant 0 : index
    %c0_3 = arith.constant 0 : index
    %c0_4 = arith.constant 0 : index
    %2 = vector.load %arg3[%c0_2, %c0_3, %c0_4] : memref<1x1x128xf32, #tpu.memory_space<vmem>>, vector<1x1x128xf32>
    %3 = vector.shape_cast %2 : vector<1x1x128xf32> to vector<1x128xf32>
    %c0_5 = arith.constant 0 : index
    %4 = memref.load %arg4[%c0_5] : memref<4xf32, #tpu.memory_space<smem>>
    %c1 = arith.constant 1 : index
    %5 = memref.load %arg4[%c1] : memref<4xf32, #tpu.memory_space<smem>>
    %c2 = arith.constant 2 : index
    %6 = memref.load %arg4[%c2] : memref<4xf32, #tpu.memory_space<smem>>
    %c3 = arith.constant 3 : index
    %7 = memref.load %arg4[%c3] : memref<4xf32, #tpu.memory_space<smem>>
    %c0_6 = arith.constant 0 : index
    %8 = memref.load %arg5[%c0_6] : memref<1xf32, #tpu.memory_space<smem>>
    %9 = vector.extract_strided_slice %1 {offsets = [0, 0], sizes = [1, 128], strides = [1, 1]} : vector<12x128xf32> to vector<1x128xf32>
    %10 = vector.broadcast %4 : f32 to vector<1x128xf32>
    %11 = arith.mulf %9, %10 : vector<1x128xf32>
    %12 = vector.extract_strided_slice %1 {offsets = [1, 0], sizes = [1, 128], strides = [1, 1]} : vector<12x128xf32> to vector<1x128xf32>
    %13 = vector.broadcast %5 : f32 to vector<1x128xf32>
    %14 = arith.mulf %12, %13 : vector<1x128xf32>
    %15 = arith.addf %11, %14 : vector<1x128xf32>
    %16 = vector.extract_strided_slice %1 {offsets = [2, 0], sizes = [1, 128], strides = [1, 1]} : vector<12x128xf32> to vector<1x128xf32>
    %17 = vector.broadcast %6 : f32 to vector<1x128xf32>
    %18 = arith.mulf %16, %17 : vector<1x128xf32>
    %19 = arith.addf %15, %18 : vector<1x128xf32>
    %20 = vector.extract_strided_slice %1 {offsets = [3, 0], sizes = [1, 128], strides = [1, 1]} : vector<12x128xf32> to vector<1x128xf32>
    %21 = vector.broadcast %7 : f32 to vector<1x128xf32>
    %22 = arith.mulf %20, %21 : vector<1x128xf32>
    %23 = arith.addf %19, %22 : vector<1x128xf32>
    %24 = vector.broadcast %8 : f32 to vector<1x128xf32>
    %25 = arith.addf %23, %24 : vector<1x128xf32>
    %26 = vector.extract_strided_slice %1 {offsets = [4, 0], sizes = [1, 128], strides = [1, 1]} : vector<12x128xf32> to vector<1x128xf32>
    %27 = vector.broadcast %4 : f32 to vector<1x128xf32>
    %28 = arith.mulf %26, %27 : vector<1x128xf32>
    %29 = vector.extract_strided_slice %1 {offsets = [5, 0], sizes = [1, 128], strides = [1, 1]} : vector<12x128xf32> to vector<1x128xf32>
    %30 = vector.broadcast %5 : f32 to vector<1x128xf32>
    %31 = arith.mulf %29, %30 : vector<1x128xf32>
    %32 = arith.addf %28, %31 : vector<1x128xf32>
    %33 = vector.extract_strided_slice %1 {offsets = [6, 0], sizes = [1, 128], strides = [1, 1]} : vector<12x128xf32> to vector<1x128xf32>
    %34 = vector.broadcast %6 : f32 to vector<1x128xf32>
    %35 = arith.mulf %33, %34 : vector<1x128xf32>
    %36 = arith.addf %32, %35 : vector<1x128xf32>
    %37 = vector.extract_strided_slice %1 {offsets = [7, 0], sizes = [1, 128], strides = [1, 1]} : vector<12x128xf32> to vector<1x128xf32>
    %38 = vector.broadcast %7 : f32 to vector<1x128xf32>
    %39 = arith.mulf %37, %38 : vector<1x128xf32>
    %40 = arith.addf %36, %39 : vector<1x128xf32>
    %41 = vector.broadcast %8 : f32 to vector<1x128xf32>
    %42 = arith.addf %40, %41 : vector<1x128xf32>
    %43 = vector.extract_strided_slice %1 {offsets = [8, 0], sizes = [1, 128], strides = [1, 1]} : vector<12x128xf32> to vector<1x128xf32>
    %44 = vector.broadcast %4 : f32 to vector<1x128xf32>
    %45 = arith.mulf %43, %44 : vector<1x128xf32>
    %46 = vector.extract_strided_slice %1 {offsets = [9, 0], sizes = [1, 128], strides = [1, 1]} : vector<12x128xf32> to vector<1x128xf32>
    %47 = vector.broadcast %5 : f32 to vector<1x128xf32>
    %48 = arith.mulf %46, %47 : vector<1x128xf32>
    %49 = arith.addf %45, %48 : vector<1x128xf32>
    %50 = vector.extract_strided_slice %1 {offsets = [10, 0], sizes = [1, 128], strides = [1, 1]} : vector<12x128xf32> to vector<1x128xf32>
    %51 = vector.broadcast %6 : f32 to vector<1x128xf32>
    %52 = arith.mulf %50, %51 : vector<1x128xf32>
    %53 = arith.addf %49, %52 : vector<1x128xf32>
    %54 = vector.extract_strided_slice %1 {offsets = [11, 0], sizes = [1, 128], strides = [1, 1]} : vector<12x128xf32> to vector<1x128xf32>
    %55 = vector.broadcast %7 : f32 to vector<1x128xf32>
    %56 = arith.mulf %54, %55 : vector<1x128xf32>
    %57 = arith.addf %53, %56 : vector<1x128xf32>
    %58 = vector.broadcast %8 : f32 to vector<1x128xf32>
    %59 = arith.addf %57, %58 : vector<1x128xf32>
    %60 = tpu.concatenate %25, %3, %42, %3, %59, %3 in 0 : vector<1x128xf32>, vector<1x128xf32>, vector<1x128xf32>, vector<1x128xf32>, vector<1x128xf32>, vector<1x128xf32> -> vector<6x128xf32>
    %c0_7 = arith.constant 0 : index
    %c0_8 = arith.constant 0 : index
    %c0_9 = arith.constant 0 : index
    %61 = vector.load %arg6[%c0_7, %c0_8, %c0_9] : memref<1x6x128xf32, #tpu.memory_space<vmem>>, vector<1x6x128xf32>
    %62 = vector.shape_cast %61 : vector<1x6x128xf32> to vector<6x128xf32>
    %63 = vector.shape_cast %60 : vector<6x128xf32> to vector<1x6x128xf32>
    tpu.vector_store %arg6[%c0_7, %c0_8, %c0_9], %63 {strides = array<i32>} : memref<1x6x128xf32, #tpu.memory_space<vmem>>, vector<1x6x128xf32>,
    return
  }
  func.func @transform_0(%arg0: i32, %arg1: i32) -> (i32, i32, i32) {
    %c0_i32 = arith.constant 0 : i32
    %c0_i32_0 = arith.constant 0 : i32
    return %arg0, %c0_i32, %arg1 : i32, i32, i32
  }
  func.func @transform_1(%arg0: i32, %arg1: i32) -> (i32, i32, i32) {
    %c0_i32 = arith.constant 0 : i32
    %c0_i32_0 = arith.constant 0 : i32
    return %arg0, %c0_i32, %arg1 : i32, i32, i32
  }
  func.func @transform_2(%arg0: i32, %arg1: i32) -> i32 {
    %c0_i32 = arith.constant 0 : i32
    %c0_i32_0 = arith.constant 0 : i32
    return %c0_i32 : i32
  }
  func.func @transform_3(%arg0: i32, %arg1: i32) -> i32 {
    %c0_i32 = arith.constant 0 : i32
    %c0_i32_0 = arith.constant 0 : i32
    return %c0_i32 : i32
  }
  func.func @transform_4(%arg0: i32, %arg1: i32) -> (i32, i32, i32) {
    %c0_i32 = arith.constant 0 : i32
    %c0_i32_0 = arith.constant 0 : i32
    return %arg0, %c0_i32, %arg1 : i32, i32, i32
  }
}

</mosaic_0001>

<bundles_post_ra>
// kernel: tpu_custom_call.1
= control target key start
LH: loop header
LB: loop body
LE: loop exit
PB: predicated region body
PF: predicated region fallthrough
CT: control target
= control target key end

     0   :  { %s806_s0 = inlined_call_operand.vmem [shape: f32[2,12,256], index: 0, kind: input, shape index: {}]   ;;  %s807_s1 = inlined_call_operand.vmem [shape: f32[2,1,256], index: 1, kind: input, shape index: {}]   ;;  %s808_s2 = inlined_call_operand.vmem [shape: f32[4], index: 2, kind: input, shape index: {}]   ;;  %s809_s3 = inlined_call_operand.<no memory space> [shape: f32[1], index: 3, kind: input, shape index: {}]   ;;  %s810_s4 = inlined_call_operand.vmem [shape: f32[2,6,256], index: 4, kind: output, shape index: {}]  }
   0x1   :  { %9 = sst [smem:[#allocation2]] %s809_s3 }
   0x2   :  { %10 = vsyncpa [#allocation5], 0  ;;  %s680_s17 = smov 0   ;;  %s682_s18 = smov 0  }
   0x3   :  { %s684_s19 = smov 0   ;;  %s686_s20 = smov 0  }
   0x4   :  { %s688_s21 = smov 0   ;;  %s690_s22 = smov 0  }
   0x5   :  { %s692_s23 = smov 0  }
   0x6 LB: > { %s489_s3 = sadd.s32 4294967295, %s649_s23   ;;  %s25_s24 = sadd.s32 1, %s641_s21  ;;  %s649_s23 = sphi %s692_s23, %s16_s23   ;;  %s645_s22 = sphi %s690_s22, %s821_s22   ;;  %s641_s21 = sphi %s688_s21, %s820_s21   ;;  %s637_s20 = sphi %s686_s20, %s819_s20   ;;  %s633_s19 = sphi %s684_s19, %s818_s19   ;;  %s629_s18 = sphi %s682_s18, %s817_s18   ;;  %s625_s17 = sphi %s680_s17, %s816_s17  }
   0x7   : > { %p26_p0 = scmp.ge.s32.totalorder %s25_s24, 2  ;;  %s28_s25 = sadd.s32 1, %s645_s22 }
   0x8   : > { %s37_s26 = sadd.s32 1, %s629_s18  ;;  %p44_p1 = scmp.ne.s32.totalorder %s629_s18, %s625_s17 }
   0x9   : > { %s823_s24 = smov (%p26_p0, %s25_s24), 0  ;;  %s825_s25 = smov (!%p26_p0, %s28_s25), %s645_s22 }
   0xa   : > { %s33_s27 = ssub.s32 %s641_s21, %s823_s24  ;;  %p45_p2 = scmp.eq.s32.totalorder %s649_s23, 0 }
   0xb   : > { %p30_p3 = scmp.ge.s32.totalorder %s825_s25, 2  ;;  %p491_p4 = scmp.ge.s32.totalorder %s649_s23, 1 }
   0xc   : > { %p728_p5 = por %p45_p2, %p44_p1  ;;  %p159_p6 = scmp.lt.s32.totalorder %s649_s23, 5 }
   0xd   : > { %s827_s25 = smov (%p30_p3, %s825_s25), 0  ;;  %p741_p8 = scmp.eq.s32.totalorder %s489_s3, 0 }
   0xe   : > { %p735_p7 = pnand %p491_p4, %p159_p6  ;;  %s32_s30 = ssub.s32 %s645_s22, %s827_s25 }
   0xf   : > { %s34_s6 = sor.u32 %s33_s27, %s32_s30  ;;  %s172_s9 = sshll.u32 %s808_s2, 4  ;;  %s173_s9 = int_to_ptr.vmem [resolvable:$true] %s172_s9 }
  0x10   : > { %s813_s29 = scalar_select %p735_p7, 1, 0 }
  0x11   : > { %p513_p9 = pneg %p735_p7  ;;  %p35_p10 = scmp.eq.s32.totalorder %s34_s6, 0 }
  0x12   : > { %s576_s11 = scalar_lea.vmem %s173_s9, 16  ;;  %p584_p2 = scmp.lt.s32.totalorder %s173_s9, %s173_s9 }
  0x13   : > { %p514_p11 = pnand %p741_p8, %p513_p9  ;;  %p577_p12 = scmp.ne.s32.totalorder %s173_s9, %s576_s11 }
  0x14   : > { %s753_s10 = scalar_select %p35_p10, %s629_s18, %s37_s26  }
  0x15   : > { %p578_p13 = pneg %p514_p11  ;;  %p585_p3 = scmp.lt.s32.totalorder %s576_s11, %s576_s11 }
  0x17   : > { %p579_p0 = pnand %p578_p13, %p577_p12  ;;  %p586_p4 = por %p585_p3, %p584_p2 }
  0x19   : > { %p580_p1 = pneg %p579_p0 }
  0x1b   : > { %p587_p6 = pnand %p586_p4, %p580_p1 }
  0x1d   : > { %590 = shalt.err (!%p587_p6)
}
  0x1e   : > { %s651_s12 = smov [#allocation4]   ;;  %p493_p7 = scmp.ge.s32.totalorder %s649_s23, 4 }
  0x1f   : > { %516 = dma.vmem_to_smem (!%p514_p11), %s173_s9, 16, %s651_s12, [#allocation5]  }
  0x20   : > { %182 = sbr.rel (%p493_p7) target bundleno = 46 (0x2e), region = 24 }
  0x27   : > { %185 = sbr.rel (!%p728_p5) target bundleno = 46 (0x2e), region = 28  ;;  %s187_s13 = sand.u32 (%p728_p5), 1, %s629_s18  }
  0x28   : > { %s495_s14 = sshll.u32 (%p728_p5), %s645_s22, 2  ;;  %s494_s15 = sshll.u32 (%p728_p5), %s187_s13, 4 }
  0x29   : > { %s191_s16 = sadd.s32 (%p728_p5), %s641_s21, %s495_s14  ;;  %s189_s6 = scalar_lea.vmem (%p728_p5), [#allocation3], %s494_s15 }
  0x2a   : > { %s496_s3 = sshll.u32 (%p728_p5), %s191_s16, 3 }
  0x2b   : > { %s193_s30 = scalar_lea.vmem (%p728_p5), %s806_s0, %s496_s3 }
  0x2c   : > { %v223_v0 = vld [vmem:[%s193_s30] sm:$0xff] (%p728_p5)  ;;  %v225_v1 = vld [vmem:[%s193_s30 + $0x10] sm:$0xff] (%p728_p5) }
  0x2d   : > { %224 = vst [vmem:[%s189_s6] sm:$0xff] (%p728_p5), %v223_v0  ;;  %226 = vst [vmem:[%s189_s6 + $0x8] sm:$0xff] (%p728_p5), %v225_v1 }
  0x2e PF: > { %p815_p5 = scmp.ne.s32.totalorder %s813_s29, 0 }
  0x2f   : > { %s248_s28 = sand.u32 (!%p815_p5), 1, %s625_s17  }
  0x30   : > { %245 = sbr.rel (%p815_p5) target bundleno = 85 (0x55), region = 70  ;;  %s498_s7 = sshll.u32 (!%p815_p5), %s248_s28, 4 }
  0x31   : > { %s250_s8 = scalar_lea.vmem (!%p815_p5), [#allocation3], %s498_s7 }
  0x37   : > { %620 = dma.done.wait (%p741_p8), [#allocation5], 16  }
  0x38   : > { %622 = vsyncadd (%p741_p8), [#allocation5], 4294967280 }
  0x39   : > { %258 = sfence }
  0x3a   : > { %p288_p7 = scmp.lt.s32.totalorder %s637_s20, 1  ;;  %s306_s9 = sld [smem:[#allocation4]]  ;;  %v303_v2 = vld [vmem:[%s250_s8] sm:$0xff]  ;;  %v304_v3 = vld [vmem:[%s250_s8 + $0x8] sm:$0xf]  ;;  %vm362_vm0 = vcmask 1040384  }
  0x3b   : > { %s503_s11 = sld [smem:[#allocation4 + $0x1]]  ;;  %p290_p9 = scmp.lt.s32.totalorder %s633_s19, 1  ;;  %vm364_vm1 = vcmask 1041408   ;;  %vm366_vm2 = vcmask 1042432   ;;  %vm368_vm3 = vcmask 1043456   ;;  %vm370_vm4 = vcmask 1044480  }
  0x3c   : > { %s829_s20 = smov (!%p288_p7, %s637_s20), 1  ;;  %s504_s29 = sld [smem:[#allocation4 + $0x2]] }
  0x3d   : > { %s505_s17 = sld [smem:[#allocation4 + $0x3]]  ;;  %s831_s19 = smov (!%p290_p9, %s633_s19), 1 }
  0x3e   : > { %s310_s12 = sld [smem:[#allocation2]]  ;;  %s500_s5 = sshll.u32 %s829_s20, 1 }
  0x3f   : > { %s775_s13 = sadd.s32 %s500_s5, %s831_s19 }
  0x40   : > { %v311_v4 = vstv %s306_s9  ;;  %s294_s15 = scalar_lea.vmem %s807_s1, %s775_s13  ;;  %s502_s19 = sshll.u32 %s775_s13, 3 }
  0x41   : > { %v313_v5 = vstv %s503_s11  ;;  %v312_v6 = vmul.f32 %v311_v4, %v303_v2  ;;  %v333_v8 = vmul.f32 %v311_v4, %v304_v3  ;;  %v506_v29 = vld [vmem:[%s294_s15] ss:$0 sm:$0xff]  ;;  %s302_s26 = scalar_lea.vmem %s810_s4, %s502_s19 }
  0x42   : > { %v314_v7 = vmul.f32 %v313_v5, %v303_v2  ;;  %v334_v9 = vmul.f32 %v313_v5, %v304_v3  ;;  %v319_v11 = vstv %s504_s29 }
  0x43   : > { %v320_v13 = vmul.f32 %v319_v11, %v303_v2  ;;  %v325_v14 = vstv %s505_s17  ;;  %v339_v15 = vmul.f32 %v319_v11, %v304_v3 }
  0x44   : > { %v316_v10 = vrot.slane %v314_v7, 1  ;;  %v336_v12 = vrot.slane %v334_v9, 1  ;;  %v326_v17 = vmul.f32 %v325_v14, %v303_v2  ;;  %v344_v19 = vmul.f32 %v325_v14, %v304_v3 }
  0x45   : > { %v322_v20 = vrot.slane %v320_v13, 2  ;;  %v341_v21 = vrot.slane %v339_v15, 2  ;;  %v331_v26 = vstv %s310_s12 }
  0x46   : > { %v318_v16 = vadd.f32 %v316_v10, %v312_v6  ;;  %v338_v18 = vadd.f32 %v336_v12, %v333_v8  ;;  %v328_v22 = vrot.slane %v326_v17, 3  ;;  %v346_v23 = vrot.slane %v344_v19, 3 }
  0x48   : > { %v324_v24 = vadd.f32 %v322_v20, %v318_v16  ;;  %v343_v25 = vadd.f32 %v341_v21, %v338_v18 }
  0x4a   : > { %v330_v27 = vadd.f32 %v328_v22, %v324_v24  ;;  %v348_v28 = vadd.f32 %v346_v23, %v343_v25 }
  0x4c   : > { %v332_v30 = vadd.f32 %v331_v26, %v330_v27  ;;  %v349_v31 = vadd.f32 %v348_v28, %v331_v26 }
  0x4e   : > { %v357_v32 = vrot.slane %v332_v30, 2  ;;  %v360_v33 = vrot.slane %v349_v31, 4  ;;  %v363_v34 = vsel %vm362_vm0, %v332_v30, %v506_v29 }
  0x50   : > { %v365_v35 = vsel %vm364_vm1, %v363_v34, %v357_v32 }
  0x51   : > { %v367_v36 = vsel %vm366_vm2, %v365_v35, %v506_v29 }
  0x52   : > { %v369_v37 = vsel %vm368_vm3, %v367_v36, %v360_v33 }
  0x53   : > { %v371_v38 = vsel %vm370_vm4, %v369_v37, %v506_v29 }
  0x54   : > { %372 = vst [vmem:[%s302_s26] sm:$0x3f] %v371_v38 }
  0x55 PF: > { %s16_s23 = sadd.s32 1, %s649_s23   ;;  %s816_s17 = smov %s629_s18 }
  0x56   : > { %p13_p8 = scmp.ge.s32.totalorder %s16_s23, 6   ;;  %s817_s18 = smov %s753_s10 }
  0x57   : > { %s818_s19 = smov %s641_s21  ;;  %s819_s20 = smov %s645_s22 }
  0x58   : > { %s820_s21 = smov %s823_s24  ;;  %s821_s22 = smov %s827_s25 }
  0x59   :  { %15 = sbr.rel (!%p13_p8) target bundleno = 6 (0x6), region = 117 }
  0x60   :  { %400 = vsyncpa [#allocation5], 1 }
  0x61   :  { %402 = vsyncpa [#allocation5 + $0x1], 1 }

</bundles_post_ra>
